<compile_context>
chip_gen: v7x
topology: tpu7x:2x2x1
jax: 0.10.0
libtpu: 0.0.40
codegen_flags: <defaults>
</compile_context>

<pallas_src>
import math

import numpy as np
import jax
import jax.numpy as jnp
from jax import lax
from jax.experimental import pallas as pl
from jax.experimental.pallas import tpu as pltpu


# Operand dtype of the conv matmuls (accumulation is always f32 on the MXU).
MATMUL_DTYPE = jnp.bfloat16
_MM_ITEMSIZE = 2 if MATMUL_DTYPE == jnp.bfloat16 else 4


def _round_up(x, m):
    return (x + m - 1) // m * m


def _pick_batch_tile(B, max_tile=4):
    """Largest divisor of B (<= max_tile) that keeps the grid at >= 2 steps (v7x)."""
    best = 1
    for d in range(1, min(B, max_tile) + 1):
        if B % d == 0 and B // d >= 2:
            best = d
    return best


# ---------------------------------------------------------------------------
# Kernel 1: box counting at several scales (exact 0/1 integer arithmetic),
#           batch-blocked so B_tile*H binary rows feed one column-pooling matmul.
# ---------------------------------------------------------------------------
def build_box_pool_mats(H, W, scales):
    """Concatenated 0/1 pooling matrices for all scales (partial boxes dropped,
    matching F.max_pool2d(kernel=stride=s)).  0/1 matrices are exact in bf16."""
    col_sizes = [W // s for s in scales]
    row_sizes = [H // s for s in scales]
    Ctot, Rtot = sum(col_sizes), sum(row_sizes)
    NCp = max(_round_up(Ctot, 128), 128)
    NRp = max(_round_up(Rtot, 8), 8)
    PC = np.zeros((W, NCp), np.float32)
    PRT = np.zeros((NRp, H), np.float32)
    blockmask = np.zeros((NRp, NCp), np.float32)
    colsel = np.zeros((NCp, 128), np.float32)
    coff = roff = 0
    for j, s in enumerate(scales):
        nc, nr = col_sizes[j], row_sizes[j]
        for c in range(nc):
            PC[c * s:(c + 1) * s, coff + c] = 1.0
        for r in range(nr):
            PRT[roff + r, r * s:(r + 1) * s] = 1.0
        blockmask[roff:roff + nr, coff:coff + nc] = 1.0
        colsel[coff:coff + nc, j] = 1.0
        coff += nc
        roff += nr
    return (jnp.asarray(PC, jnp.bfloat16), jnp.asarray(PRT, jnp.bfloat16),
            jnp.asarray(blockmask), jnp.asarray(colsel, jnp.bfloat16))


def box_counting_counts(x2, med, PC, PRT, blockmask, colsel, num_scales_out, b_tile):
    """x2 (B,H,W) f32, med (B,) f32 -> per-scale occupied-box counts (B, S)."""
    B, H, W = x2.shape
    NRp, NCp = blockmask.shape

    def kernel(med_ref, x_ref, pc_ref, prt_ref, bm_ref, cs_ref, o_ref):
        b0 = pl.program_id(0) * b_tile
        # Threshold every image of this block and stack them on the MXU row axis.
        rows = [(x_ref[t] > med_ref[b0 + t]).astype(jnp.bfloat16) for t in range(b_tile)]
        stacked = jnp.concatenate(rows, axis=0) if b_tile > 1 else rows[0]   # (b_tile*H, W)
        inner = jnp.dot(stacked, pc_ref[...],
                        preferred_element_type=jnp.float32)                 # column pooling
        for t in range(b_tile):
            inner_t = inner[t * H:(t + 1) * H, :].astype(jnp.bfloat16)      # counts <= 64: exact
            boxes = jnp.dot(prt_ref[...], inner_t,
                            preferred_element_type=jnp.float32)             # (NRp, NCp)
            occ = ((boxes * bm_ref[...]) > 0.0).astype(jnp.bfloat16)        # occupied boxes
            per_scale = jnp.dot(occ, cs_ref[...],
                                preferred_element_type=jnp.float32)         # (NRp, 128)
            o_ref[t] = jnp.sum(per_scale, axis=0, keepdims=True)            # (1, 128)

    res = pl.pallas_call(
        kernel,
        grid=(B // b_tile,),
        in_specs=[
            pl.BlockSpec(memory_space=pltpu.MemorySpace.SMEM),               # med (B,)
            pl.BlockSpec((b_tile, H, W), lambda i: (i, 0, 0)),               # images
            pl.BlockSpec((W, NCp), lambda i: (0, 0)),                        # col pooling
            pl.BlockSpec((NRp, H), lambda i: (0, 0)),                        # row pooling^T
            pl.BlockSpec((NRp, NCp), lambda i: (0, 0)),                      # block mask
            pl.BlockSpec((NCp, 128), lambda i: (0, 0)),                      # scale selector
        ],
        out_specs=pl.BlockSpec((b_tile, 1, 128), lambda i: (i, 0, 0)),
        out_shape=jax.ShapeDtypeStruct((B, 1, 128), jnp.float32),
        compiler_params=pltpu.CompilerParams(dimension_semantics=("parallel",)),
    )(med, x2, PC, PRT, blockmask, colsel)
    return res[:, 0, :num_scales_out]


# ---------------------------------------------------------------------------
# Kernel 2: all large KxK "same" convs as ONE banded MXU matmul per batch block,
#           fused with the fractal-dimension modulation.
# ---------------------------------------------------------------------------
def multiscale_conv_modulate(xp, T_all, scale_rows, shift_rows, H, b_tile):
    """xp (B,Hp,Wp) padded input (MATMUL_DTYPE); T_all (Kmax*Wp, NC) stacked banded
    weights; scale_rows/shift_rows (B,1,NC) f32 per-lane fd and fd*bias rows.
    Returns (B, H, NC) MATMUL_DTYPE with out[b, y, l*W+x] = (conv_l(x)[y,x]+bias_l)*fd_l."""
    B, Hp, Wp = xp.shape
    KW, NC = T_all.shape
    Kmax = KW // Wp
    M = b_tile * H

    def kernel(xp_ref, t_ref, sc_ref, sh_ref, o_ref, lhs_ref, acc_ref):
        # im2row: one shifted row-slab per dy, with the batch images stacked on the
        # MXU row axis.  Pure copies (no output RMW); the whole contraction below is
        # a single MXU dot so accumulation stays in the MXU result path.
        for dy in range(Kmax):
            for t in range(b_tile):
                lhs_ref[t * H:(t + 1) * H, dy * Wp:(dy + 1) * Wp] = xp_ref[t, dy:dy + H, :]
        acc_ref[...] = jnp.dot(lhs_ref[...], t_ref[...],
                               preferred_element_type=jnp.float32)           # (M, NC)
        for t in range(b_tile):
            mod = acc_ref[t * H:(t + 1) * H, :] * sc_ref[t] + sh_ref[t]      # (conv+bias)*fd
            o_ref[t] = mod.astype(o_ref.dtype)

    # Re-derived VMEM budget (double-buffered inputs/outputs + scratch + headroom).
    vmem_limit = int(2 * (b_tile * Hp * Wp + KW * NC) * _MM_ITEMSIZE
                     + 2 * b_tile * H * NC * _MM_ITEMSIZE
                     + M * KW * _MM_ITEMSIZE + M * NC * 4
                     + (6 << 20))

    return pl.pallas_call(
        kernel,
        grid=(B // b_tile,),
        in_specs=[
            pl.BlockSpec((b_tile, Hp, Wp), lambda i: (i, 0, 0)),
            pl.BlockSpec((KW, NC), lambda i: (0, 0)),        # constant weight slab
            pl.BlockSpec((b_tile, 1, NC), lambda i: (i, 0, 0)),
            pl.BlockSpec((b_tile, 1, NC), lambda i: (i, 0, 0)),
        ],
        out_specs=pl.BlockSpec((b_tile, H, NC), lambda i: (i, 0, 0)),
        out_shape=jax.ShapeDtypeStruct((B, H, NC), MATMUL_DTYPE),
        scratch_shapes=[pltpu.VMEM((M, KW), MATMUL_DTYPE),
                        pltpu.VMEM((M, NC), jnp.float32)],
        compiler_params=pltpu.CompilerParams(
            dimension_semantics=("parallel",),
            vmem_limit_bytes=vmem_limit),
    )(xp, T_all, scale_rows, shift_rows)


# ---------------------------------------------------------------------------
# Kernel 3: fusion = 3x3 conv (NL->Cout) on the MXU + GroupNorm + SiLU, consuming
#           kernel 2's lane-layout features directly (no XLA transpose/pad glue).
# ---------------------------------------------------------------------------
def fusion_block(feat, RHS3, affine, H, W, n_in, Cout, b_tile, groups=4, eps=1e-5):
    """feat (B, H, NCf) lane-layout features (feat[b, y, c*W + x], MATMUL_DTYPE);
    RHS3 (n_in*3*Wp2, Cout*W) banded 3x3 weights with output channels on lanes;
    affine (3, Cout*W) f32 rows = [conv bias, GN gamma, GN beta] repeated per lane.
    Returns (B, H, Cout*W) f32 with out[b, y, o*W + x]."""
    B, _, NCf = feat.shape
    KW, NCo = RHS3.shape
    Wp2 = KW // (n_in * 3)
    cpg = Cout // groups
    gw = cpg * W                                   # lanes per GroupNorm group
    n_elem = float(cpg * H * W)
    M = b_tile * H

    def kernel(f_ref, r_ref, aff_ref, o_ref, lhs_ref, conv_ref):
        # Build the 9-slab (input channel x dy) im2row LHS directly from the lane
        # layout; the zero scratch supplies the conv's zero padding rows/cols.
        lhs_ref[...] = jnp.zeros_like(lhs_ref)
        for t in range(b_tile):
            for c in range(n_in):
                for dy in range(3):
                    j = c * 3 + dy
                    y_lo = max(0, 1 - dy)
                    y_hi = min(H, H + 1 - dy)
                    lhs_ref[t * H + y_lo:t * H + y_hi, j * Wp2:j * Wp2 + W] = \
                        f_ref[t, y_lo + dy - 1:y_hi + dy - 1, c * W:(c + 1) * W]
        # One dot for the whole conv of all images in the block (all 16 output
        # channels lane-dense), then GroupNorm on lane slices of the result.
        conv_ref[...] = jnp.dot(lhs_ref[...], r_ref[...],
                                preferred_element_type=jnp.float32)          # (M, Cout*W)
        inv_n = 1.0 / n_elem
        for t in range(b_tile):
            for g in range(groups):
                lo = g * gw
                v = conv_ref[t * H:(t + 1) * H, lo:lo + gw] + aff_ref[0:1, lo:lo + gw]
                s1 = jnp.sum(jnp.sum(v, axis=1, keepdims=True), axis=0, keepdims=True)
                mean = s1 * inv_n
                d0 = v - mean                                                # two-pass var
                s2 = jnp.sum(jnp.sum(d0 * d0, axis=1, keepdims=True), axis=0, keepdims=True)
                inv = lax.rsqrt(s2 * inv_n + eps)
                yv = d0 * inv * aff_ref[1:2, lo:lo + gw] + aff_ref[2:3, lo:lo + gw]
                o_ref[t, :, lo:lo + gw] = yv * (1.0 / (1.0 + jnp.exp(-yv)))  # exact SiLU

    vmem_limit = int(2 * (b_tile * H * NCf * _MM_ITEMSIZE + KW * NCo * _MM_ITEMSIZE
                          + 3 * NCo * 4)
                     + 2 * M * NCo * 4
                     + M * KW * _MM_ITEMSIZE + M * NCo * 4
                     + (6 << 20))

    return pl.pallas_call(
        kernel,
        grid=(B // b_tile,),
        in_specs=[
            pl.BlockSpec((b_tile, H, NCf), lambda i: (i, 0, 0)),
            pl.BlockSpec((KW, NCo), lambda i: (0, 0)),
            pl.BlockSpec((3, NCo), lambda i: (0, 0)),
        ],
        out_specs=pl.BlockSpec((b_tile, H, NCo), lambda i: (i, 0, 0)),
        out_shape=jax.ShapeDtypeStruct((B, H, NCo), jnp.float32),
        scratch_shapes=[pltpu.VMEM((M, KW), MATMUL_DTYPE),
                        pltpu.VMEM((M, NCo), jnp.float32)],
        compiler_params=pltpu.CompilerParams(
            dimension_semantics=("parallel",),
            vmem_limit_bytes=vmem_limit),
    )(feat, RHS3, affine)


# ---------------------------------------------------------------------------
# Parameters + full forward pass (tiny scalar glue in plain JAX, hot paths in Pallas).
# ---------------------------------------------------------------------------
def init_params(key, num_scales=3, base_scale=16, cout=16):
    keys = jax.random.split(key, 2 * num_scales + 2)
    convs = []
    for i in range(num_scales):
        K = 2 ** i * base_scale + 1
        w = jax.random.normal(keys[2 * i], (K, K), jnp.float32) / math.sqrt(K * K)
        b = jax.random.normal(keys[2 * i + 1], (1,), jnp.float32) * 0.1
        convs.append((w, b))
    fw = jax.random.normal(keys[-2], (cout, num_scales, 3, 3), jnp.float32) / math.sqrt(9 * num_scales)
    fb = jax.random.normal(keys[-1], (cout,), jnp.float32) * 0.1
    gamma = jnp.ones((cout,), jnp.float32)
    beta = jnp.zeros((cout,), jnp.float32)
    return dict(convs=convs, fusion_w=fw, fusion_b=fb, gamma=gamma, beta=beta)


def fractal_feature_extractor(x, params, num_scales=3, base_scale=16):
    B, C, H, W = x.shape
    assert C == 1, "conv_layers are Conv2d(1, 1, ...) -> input must have 1 channel"
    x2 = x[:, 0].astype(jnp.float32)                                      # (B, H, W)
    b_tile = _pick_batch_tile(B)

    # per-image median (torch.median: lower of the two middles for even counts)
    med = jnp.sort(x2.reshape(B, H * W), axis=-1)[:, (H * W - 1) // 2]    # (B,)

    # per-layer valid box-counting scales and the union actually needed
    layer_scales = []
    for i in range(num_scales):
        scale = 2 ** i * base_scale
        cand = [scale // 4, scale // 2, scale, scale * 2, scale * 4]
        layer_scales.append([s for s in cand if s <= H and s <= W])
    active = [i for i in range(num_scales) if len(layer_scales[i]) >= 3]
    union = sorted({s for i in active for s in layer_scales[i]})
    idx_of = {s: j for j, s in enumerate(union)}
    S = len(union)
    assert 1 <= S <= 128

    PC, PRT, bm, cs = build_box_pool_mats(H, W, union)
    counts = box_counting_counts(x2, med, PC, PRT, bm, cs, S, b_tile)     # (B, S)

    # fractal dimension per active layer: slope of log(count) vs log(1/s) (lstsq)
    fds = []
    for i in active:
        valid = layer_scales[i]
        n = len(valid)
        xs = np.array([math.log(1.0 / s) for s in valid], dtype=np.float32)
        y = jnp.stack([jnp.log(counts[:, idx_of[s]] + 1e-6) for s in valid], axis=0)  # (n, B)
        sx, sxx = float(xs.sum()), float((xs * xs).sum())
        sy = jnp.sum(y, axis=0)
        sxy = jnp.sum(jnp.asarray(xs)[:, None] * y, axis=0)
        fds.append((n * sxy - sx * sy) / (n * sxx - sx * sx))             # (B,)

    NL = len(active)
    assert NL == params["fusion_w"].shape[1], "fusion expects num_scales feature maps"
    fd_all = jnp.stack(fds, axis=1)                                       # (B, NL)

    # -- kernel 2: every KxK kernel embedded into a Kmax x Kmax one, stacked as banded
    #    matrices with the layer axis on output lanes.
    Kmax = max(2 ** i * base_scale + 1 for i in active)
    Pmax = Kmax // 2
    Wp = _round_up(W + 2 * Pmax, 128)
    NC = _round_up(NL * W, 128)
    xp = jnp.pad(x2, ((0, 0), (Pmax, Pmax), (Pmax, Wp - W - Pmax))).astype(MATMUL_DTYPE)

    q = np.arange(Wp)[:, None]
    xcol = np.arange(W)[None, :]
    d = q - xcol
    band_valid = (d >= 0) & (d < Kmax)
    d_clip = np.clip(d, 0, Kmax - 1)
    T_cols, bias_vals = [], []
    for i in active:
        w, bconv = params["convs"][i]
        K = w.shape[0]
        off = Pmax - K // 2
        w_emb = jnp.zeros((Kmax, Kmax), jnp.float32).at[off:off + K, off:off + K].set(
            w.astype(jnp.float32))
        band = jnp.where(band_valid[None, :, :], w_emb[:, d_clip], 0.0)   # (Kmax, Wp, W)
        T_cols.append(band.reshape(Kmax * Wp, W))
        bias_vals.append(bconv.astype(jnp.float32)[0])
    T_all = jnp.pad(jnp.concatenate(T_cols, axis=1),
                    ((0, 0), (0, NC - NL * W))).astype(MATMUL_DTYPE)       # (Kmax*Wp, NC)

    bias_row = jnp.pad(jnp.repeat(jnp.stack(bias_vals), W), (0, NC - NL * W))        # (NC,)
    scale_rows = jnp.pad(jnp.repeat(fd_all, W, axis=1), ((0, 0), (0, NC - NL * W)))  # (B, NC)
    shift_rows = (scale_rows * bias_row[None, :]).reshape(B, 1, NC)
    scale_rows = scale_rows.reshape(B, 1, NC)

    feat_lanes = multiscale_conv_modulate(xp, T_all, scale_rows, shift_rows, H, b_tile)  # (B,H,NC)

    # -- kernel 3: fused 3x3 conv (NL -> Cout) + GroupNorm(4, Cout) + SiLU, reading the
    #    lane-layout features directly.
    fw = params["fusion_w"].astype(jnp.float32)
    Cout = fw.shape[0]
    Wp2 = _round_up(W + 1, 128)

    q3 = np.arange(Wp2)[:, None]
    d3 = q3 - xcol + 1                                                     # dx into 3-wide kernel
    valid3 = (d3 >= 0) & (d3 < 3)
    d3_clip = np.clip(d3, 0, 2)
    band3 = jnp.where(valid3[None, None, None, :, :], fw[:, :, :, d3_clip], 0.0)   # (Cout,NL,3,Wp2,W)
    RHS3 = band3.transpose(1, 2, 3, 0, 4).reshape(NL * 3 * Wp2, Cout * W).astype(MATMUL_DTYPE)

    affine = jnp.stack([
        jnp.repeat(params["fusion_b"].astype(jnp.float32), W),
        jnp.repeat(params["gamma"].astype(jnp.float32), W),
        jnp.repeat(params["beta"].astype(jnp.float32), W),
    ], axis=0)                                                             # (3, Cout*W)

    out_lanes = fusion_block(feat_lanes, RHS3, affine, H, W, NL, Cout, b_tile, groups=4)  # (B,H,Cout*W)
    # final NCHW transpose left to XLA: it is tiny at these sizes and keeps every
    # in-kernel store lane-dense (unmasked 1024-lane stores).
    return out_lanes.reshape(B, H, Cout, W).transpose(0, 2, 1, 3)          # (B, Cout, H, W)


# ---------------------------------------------------------------------------
if __name__ == "__main__":
    # H=W=64 is the smallest size for which all 3 fractal scales are active (so the
    # fusion Conv2d(3, 16) gets 3 feature maps); B=4 keeps the batch-blocked grids at
    # 2 even steps (v7x megacore) with B_tile=2.
    B, C, H, W = 4, 1, 64, 64
    x = jax.random.normal(jax.random.PRNGKey(0), (B, C, H, W), dtype=jnp.float32)
    params = init_params(jax.random.PRNGKey(1))

    out = fractal_feature_extractor(x, params)
    out = jax.block_until_ready(out)
    assert out.shape == (B, 16, H, W), out.shape
    assert bool(jnp.all(jnp.isfinite(out)))

    # sanity check: Pallas box counts match a pure-JAX reference exactly
    # (0/1 operands and small integer partial sums stay exact even with bf16 MXU inputs)
    x2 = x[:, 0]
    med = jnp.sort(x2.reshape(B, -1), axis=-1)[:, (H * W - 1) // 2]
    scales = [4, 8, 16, 32, 64]
    PC, PRT, bm, cs = build_box_pool_mats(H, W, scales)
    got = box_counting_counts(x2, med, PC, PRT, bm, cs, len(scales), _pick_batch_tile(B))
    binary = (x2 > med[:, None, None]).astype(jnp.float32)
    ref = jnp.stack(
        [binary.reshape(B, H // s, s, W // s, s).max(axis=(2, 4)).sum(axis=(1, 2)) for s in scales],
        axis=1)
    assert bool(jnp.all(got == ref))

    print("KERNEL_OK")
</pallas_src>

<mosaic_0001>
module attributes {stable_mosaic.version = 11 : i64} {
  func.func @kernel(%arg0: i32, %arg1: memref<4xf32, #tpu.memory_space<smem>>, %arg2: memref<2x64x64xf32, #tpu.memory_space<vmem>>, %arg3: memref<64x128xbf16, #tpu.memory_space<vmem>>, %arg4: memref<32x64xbf16, #tpu.memory_space<vmem>>, %arg5: memref<32x128xf32, #tpu.memory_space<vmem>>, %arg6: memref<128x128xbf16, #tpu.memory_space<vmem>>, %arg7: memref<2x1x128xf32, #tpu.memory_space<vmem>>) attributes {dimension_semantics = [#tpu.dimension_semantics<parallel>], iteration_bounds = array<i64: 2>, scalar_prefetch = 0 : i64, scratch_operands = 0 : i64, tpu.core_type = #tpu.core_type<tc>, window_params = [{transform_indices = @transform_0, window_bounds = array<i64: 4>}, {transform_indices = @transform_1, window_bounds = array<i64: 2, 64, 64>}, {pipeline_mode = #tpu.pipeline_mode<synchronous>, transform_indices = @transform_2, window_bounds = array<i64: 64, 128>}, {pipeline_mode = #tpu.pipeline_mode<synchronous>, transform_indices = @transform_3, window_bounds = array<i64: 32, 64>}, {pipeline_mode = #tpu.pipeline_mode<synchronous>, transform_indices = @transform_4, window_bounds = array<i64: 32, 128>}, {pipeline_mode = #tpu.pipeline_mode<synchronous>, transform_indices = @transform_5, window_bounds = array<i64: 128, 128>}, {transform_indices = @transform_6, window_bounds = array<i64: 2, 1, 128>}]} {
    %c2_i32 = arith.constant 2 : i32
    %0 = arith.muli %arg0, %c2_i32 : i32
    %c0 = arith.constant 0 : index
    %c0_0 = arith.constant 0 : index
    %c0_1 = arith.constant 0 : index
    %1 = vector.load %arg2[%c0, %c0_0, %c0_1] : memref<2x64x64xf32, #tpu.memory_space<vmem>>, vector<1x64x64xf32>
    %2 = vector.shape_cast %1 : vector<1x64x64xf32> to vector<64x64xf32>
    %c0_i32 = arith.constant 0 : i32
    %3 = arith.addi %0, %c0_i32 : i32
    %4 = arith.index_cast %3 : i32 to index
    %5 = memref.load %arg1[%4] : memref<4xf32, #tpu.memory_space<smem>>
    %6 = vector.broadcast %5 : f32 to vector<64x64xf32>
    %7 = arith.cmpf ogt, %2, %6 : vector<64x64xf32>
    %8 = arith.extui %7 : vector<64x64xi1> to vector<64x64xi32>
    %9 = arith.sitofp %8 : vector<64x64xi32> to vector<64x64xf32>
    %10 = arith.truncf %9 : vector<64x64xf32> to vector<64x64xbf16>
    %c1 = arith.constant 1 : index
    %c0_2 = arith.constant 0 : index
    %c0_3 = arith.constant 0 : index
    %11 = vector.load %arg2[%c1, %c0_2, %c0_3] : memref<2x64x64xf32, #tpu.memory_space<vmem>>, vector<1x64x64xf32>
    %12 = vector.shape_cast %11 : vector<1x64x64xf32> to vector<64x64xf32>
    %c1_i32 = arith.constant 1 : i32
    %13 = arith.addi %0, %c1_i32 : i32
    %14 = arith.index_cast %13 : i32 to index
    %15 = memref.load %arg1[%14] : memref<4xf32, #tpu.memory_space<smem>>
    %16 = vector.broadcast %15 : f32 to vector<64x64xf32>
    %17 = arith.cmpf ogt, %12, %16 : vector<64x64xf32>
    %18 = arith.extui %17 : vector<64x64xi1> to vector<64x64xi32>
    %19 = arith.sitofp %18 : vector<64x64xi32> to vector<64x64xf32>
    %20 = arith.truncf %19 : vector<64x64xf32> to vector<64x64xbf16>
    %21 = tpu.concatenate %10, %20 in 0 : vector<64x64xbf16>, vector<64x64xbf16> -> vector<128x64xbf16>
    %c0_4 = arith.constant 0 : index
    %c0_5 = arith.constant 0 : index
    %22 = vector.load %arg3[%c0_4, %c0_5] : memref<64x128xbf16, #tpu.memory_space<vmem>>, vector<64x128xbf16>
    %cst = arith.constant dense<0.000000e+00> : vector<128x128xf32>
    %23 = tpu.matmul %21, %22, %cst {dimension_numbers = #tpu.dot_dimension_numbers<[1], [0], [0], [1], [0, 0, 1, 1], [], []>} : vector<128x64xbf16>, vector<64x128xbf16>, vector<128x128xf32> -> vector<128x128xf32>
    %24 = vector.extract_strided_slice %23 {offsets = [0, 0], sizes = [64, 128], strides = [1, 1]} : vector<128x128xf32> to vector<64x128xf32>
    %25 = arith.truncf %24 : vector<64x128xf32> to vector<64x128xbf16>
    %c0_6 = arith.constant 0 : index
    %c0_7 = arith.constant 0 : index
    %26 = vector.load %arg4[%c0_6, %c0_7] : memref<32x64xbf16, #tpu.memory_space<vmem>>, vector<32x64xbf16>
    %cst_8 = arith.constant dense<0.000000e+00> : vector<32x128xf32>
    %27 = tpu.matmul %26, %25, %cst_8 {dimension_numbers = #tpu.dot_dimension_numbers<[1], [0], [0], [1], [0, 0, 1, 1], [], []>} : vector<32x64xbf16>, vector<64x128xbf16>, vector<32x128xf32> -> vector<32x128xf32>
    %c0_9 = arith.constant 0 : index
    %c0_10 = arith.constant 0 : index
    %28 = vector.load %arg5[%c0_9, %c0_10] : memref<32x128xf32, #tpu.memory_space<vmem>>, vector<32x128xf32>
    %29 = arith.mulf %27, %28 : vector<32x128xf32>
    %cst_11 = arith.constant 0.000000e+00 : f32
    %30 = vector.broadcast %cst_11 : f32 to vector<32x128xf32>
    %31 = arith.cmpf ogt, %29, %30 : vector<32x128xf32>
    %32 = arith.extui %31 : vector<32x128xi1> to vector<32x128xi32>
    %33 = arith.sitofp %32 : vector<32x128xi32> to vector<32x128xf32>
    %34 = arith.truncf %33 : vector<32x128xf32> to vector<32x128xbf16>
    %c0_12 = arith.constant 0 : index
    %c0_13 = arith.constant 0 : index
    %35 = vector.load %arg6[%c0_12, %c0_13] : memref<128x128xbf16, #tpu.memory_space<vmem>>, vector<128x128xbf16>
    %cst_14 = arith.constant dense<0.000000e+00> : vector<32x128xf32>
    %36 = tpu.matmul %34, %35, %cst_14 {dimension_numbers = #tpu.dot_dimension_numbers<[1], [0], [0], [1], [0, 0, 1, 1], [], []>} : vector<32x128xbf16>, vector<128x128xbf16>, vector<32x128xf32> -> vector<32x128xf32>
    %cst_15 = arith.constant dense<0.000000e+00> : vector<128xf32>
    %37 = vector.multi_reduction <add>, %36, %cst_15 [0] : vector<32x128xf32> to vector<128xf32>
    %38 = vector.shape_cast %37 : vector<128xf32> to vector<1x128xf32>
    %c0_16 = arith.constant 0 : index
    %c0_17 = arith.constant 0 : index
    %c0_18 = arith.constant 0 : index
    %39 = vector.load %arg7[%c0_16, %c0_17, %c0_18] : memref<2x1x128xf32, #tpu.memory_space<vmem>>, vector<1x1x128xf32>
    %40 = vector.shape_cast %39 : vector<1x1x128xf32> to vector<1x128xf32>
    %41 = vector.shape_cast %38 : vector<1x128xf32> to vector<1x1x128xf32>
    tpu.vector_store %arg7[%c0_16, %c0_17, %c0_18], %41 {strides = array<i32>} : memref<2x1x128xf32, #tpu.memory_space<vmem>>, vector<1x1x128xf32>,
    %42 = vector.extract_strided_slice %23 {offsets = [64, 0], sizes = [64, 128], strides = [1, 1]} : vector<128x128xf32> to vector<64x128xf32>
    %43 = arith.truncf %42 : vector<64x128xf32> to vector<64x128xbf16>
    %c0_19 = arith.constant 0 : index
    %c0_20 = arith.constant 0 : index
    %44 = vector.load %arg4[%c0_19, %c0_20] : memref<32x64xbf16, #tpu.memory_space<vmem>>, vector<32x64xbf16>
    %cst_21 = arith.constant dense<0.000000e+00> : vector<32x128xf32>
    %45 = tpu.matmul %44, %43, %cst_21 {dimension_numbers = #tpu.dot_dimension_numbers<[1], [0], [0], [1], [0, 0, 1, 1], [], []>} : vector<32x64xbf16>, vector<64x128xbf16>, vector<32x128xf32> -> vector<32x128xf32>
    %c0_22 = arith.constant 0 : index
    %c0_23 = arith.constant 0 : index
    %46 = vector.load %arg5[%c0_22, %c0_23] : memref<32x128xf32, #tpu.memory_space<vmem>>, vector<32x128xf32>
    %47 = arith.mulf %45, %46 : vector<32x128xf32>
    %cst_24 = arith.constant 0.000000e+00 : f32
    %48 = vector.broadcast %cst_24 : f32 to vector<32x128xf32>
    %49 = arith.cmpf ogt, %47, %48 : vector<32x128xf32>
    %50 = arith.extui %49 : vector<32x128xi1> to vector<32x128xi32>
    %51 = arith.sitofp %50 : vector<32x128xi32> to vector<32x128xf32>
    %52 = arith.truncf %51 : vector<32x128xf32> to vector<32x128xbf16>
    %c0_25 = arith.constant 0 : index
    %c0_26 = arith.constant 0 : index
    %53 = vector.load %arg6[%c0_25, %c0_26] : memref<128x128xbf16, #tpu.memory_space<vmem>>, vector<128x128xbf16>
    %cst_27 = arith.constant dense<0.000000e+00> : vector<32x128xf32>
    %54 = tpu.matmul %52, %53, %cst_27 {dimension_numbers = #tpu.dot_dimension_numbers<[1], [0], [0], [1], [0, 0, 1, 1], [], []>} : vector<32x128xbf16>, vector<128x128xbf16>, vector<32x128xf32> -> vector<32x128xf32>
    %cst_28 = arith.constant dense<0.000000e+00> : vector<128xf32>
    %55 = vector.multi_reduction <add>, %54, %cst_28 [0] : vector<32x128xf32> to vector<128xf32>
    %56 = vector.shape_cast %55 : vector<128xf32> to vector<1x128xf32>
    %c1_29 = arith.constant 1 : index
    %c0_30 = arith.constant 0 : index
    %c0_31 = arith.constant 0 : index
    %57 = vector.load %arg7[%c1_29, %c0_30, %c0_31] : memref<2x1x128xf32, #tpu.memory_space<vmem>>, vector<1x1x128xf32>
    %58 = vector.shape_cast %57 : vector<1x1x128xf32> to vector<1x128xf32>
    %59 = vector.shape_cast %56 : vector<1x128xf32> to vector<1x1x128xf32>
    tpu.vector_store %arg7[%c1_29, %c0_30, %c0_31], %59 {strides = array<i32>} : memref<2x1x128xf32, #tpu.memory_space<vmem>>, vector<1x1x128xf32>,
    return
  }
  func.func @transform_0(%arg0: i32) -> i32 {
    %c0_i32 = arith.constant 0 : i32
    %c0_i32_0 = arith.constant 0 : i32
    return %c0_i32 : i32
  }
  func.func @transform_1(%arg0: i32) -> (i32, i32, i32) {
    %c0_i32 = arith.constant 0 : i32
    %c0_i32_0 = arith.constant 0 : i32
    %c0_i32_1 = arith.constant 0 : i32
    return %arg0, %c0_i32, %c0_i32_0 : i32, i32, i32
  }
  func.func @transform_2(%arg0: i32) -> (i32, i32) {
    %c0_i32 = arith.constant 0 : i32
    %c0_i32_0 = arith.constant 0 : i32
    %c0_i32_1 = arith.constant 0 : i32
    return %c0_i32, %c0_i32_0 : i32, i32
  }
  func.func @transform_3(%arg0: i32) -> (i32, i32) {
    %c0_i32 = arith.constant 0 : i32
    %c0_i32_0 = arith.constant 0 : i32
    %c0_i32_1 = arith.constant 0 : i32
    return %c0_i32, %c0_i32_0 : i32, i32
  }
  func.func @transform_4(%arg0: i32) -> (i32, i32) {
    %c0_i32 = arith.constant 0 : i32
    %c0_i32_0 = arith.constant 0 : i32
    %c0_i32_1 = arith.constant 0 : i32
    return %c0_i32, %c0_i32_0 : i32, i32
  }
  func.func @transform_5(%arg0: i32) -> (i32, i32) {
    %c0_i32 = arith.constant 0 : i32
    %c0_i32_0 = arith.constant 0 : i32
    %c0_i32_1 = arith.constant 0 : i32
    return %c0_i32, %c0_i32_0 : i32, i32
  }
  func.func @transform_6(%arg0: i32) -> (i32, i32, i32) {
    %c0_i32 = arith.constant 0 : i32
    %c0_i32_0 = arith.constant 0 : i32
    %c0_i32_1 = arith.constant 0 : i32
    return %arg0, %c0_i32, %c0_i32_0 : i32, i32, i32
  }
}

</mosaic_0001>

<bundles_post_ra>
// kernel: tpu_custom_call.1
= control target key start
LH: loop header
LB: loop body
LE: loop exit
PB: predicated region body
PF: predicated region fallthrough
CT: control target
= control target key end

     0   :  { %11 = vsyncpa [#allocation5], 0  ;;  %s2142_s0 = inlined_call_operand.hbm [shape: f32[4], index: 0, kind: input, shape index: {}]   ;;  %s2143_s1 = inlined_call_operand.hbm [shape: f32[4,64,64], index: 1, kind: input, shape index: {}]   ;;  %s2144_s2 = inlined_call_operand.hbm [shape: bf16[64,128], index: 2, kind: input, shape index: {}]   ;;  %s2145_s3 = inlined_call_operand.hbm [shape: bf16[32,64], index: 3, kind: input, shape index: {}]   ;;  %s2146_s4 = inlined_call_operand.hbm [shape: f32[32,128], index: 4, kind: input, shape index: {}]   ;;  %s2147_s5 = inlined_call_operand.hbm [shape: bf16[128,128], index: 5, kind: input, shape index: {}]   ;;  %s2148_s6 = inlined_call_operand.hbm [shape: f32[4,1,128], index: 6, kind: output, shape index: {}]  }
   0x1   :  { %12 = vsyncpa [#allocation3], 0 }
   0x2   :  { %14 = vsyncpa [#allocation3 + $0x1], 0 }
   0x3   :  { %15 = vsyncpa [#allocation8], 0 }
   0x4   :  { %16 = vsyncpa [#allocation11], 0 }
   0x5   :  { %17 = vsyncpa [#allocation4], 0 }
   0x6   :  { %19 = vsyncpa [#allocation4 + $0x1], 0  ;;  %s1803_s21 = smov 0   ;;  %s1805_s22 = smov 0  }
   0x7   :  { %s1807_s23 = smov 0   ;;  %s1809_s24 = smov 0  }
   0x8 LB: > { %s1753_s25 = smov [#allocation7]   ;;  %s1824_s27 = sadd.s32 4294967295, %s1751_s24   ;;  %s1751_s24 = sphi %s1809_s24, %s2175_s24   ;;  %s1747_s23 = sphi %s1807_s23, %s2174_s23   ;;  %s1743_s22 = sphi %s1805_s22, %s2173_s22   ;;  %s1739_s21 = sphi %s1803_s21, %s2172_s21  }
   0x9   : > { %s208_s26 = sshll.u32 %s1753_s25, 4  ;;  %p1152_p0 = scmp.ge.s32.totalorder %s1751_s24, 1  ;;  %s1829_s26 = int_to_ptr.vmem [resolvable:$true] %s208_s26 }
   0xa   : > { %p2150_p1 = scmp.eq.s32.totalorder %s1824_s27, 0  ;;  %p187_p2 = scmp.lt.s32.totalorder %s1751_s24, 3 }
   0xb   : > { %s1754_s29 = smov [#allocation10]   ;;  %s1518_s10 = scalar_lea.hbm %s2144_s2, 512 }
   0xc   : > { %p1831_p3 = pnand %p1152_p0, %p187_p2  ;;  %s234_s30 = sshll.u32 %s1754_s29, 4  ;;  %s1844_s30 = int_to_ptr.vmem [resolvable:$true] %s234_s30 }
   0xd   : > { %p1519_p7 = scmp.ne.s32.totalorder %s2144_s2, %s1518_s10  ;;  %p1525_p11 = scmp.lt.u32.totalorder %s1518_s10, %s2144_s2 }
   0xe   : > { %s2153_s28 = scalar_select %p1831_p3, 1, 0 }
   0xf   : > { %p1413_p5 = pneg %p1831_p3 }
  0x11   : > { %p1840_p6 = pnand %p1413_p5, %p2150_p1 }
  0x13   : > { %p1854_p8 = pneg %p1840_p6 }
  0x15   : > { %p1521_p9 = pnand %p1854_p8, %p1519_p7 }
  0x17   : > { %p1522_p10 = pneg %p1521_p9 }
  0x19   : > { %p1527_p12 = pnand %p1525_p11, %p1522_p10 }
  0x1b   : > { %1530 = shalt.err (!%p1527_p12)
}
  0x1c   : > { %s1531_s16 = scalar_lea.vmem %s1829_s26, 512  ;;  %p1539_p5 = scmp.lt.s32.totalorder %s1829_s26, %s1829_s26 }
  0x1d   : > { %p1532_p13 = scmp.ne.s32.totalorder %s1829_s26, %s1531_s16  ;;  %p1540_p4 = scmp.lt.s32.totalorder %s1531_s16, %s1531_s16 }
  0x1f   : > { %p1534_p0 = pnand %p1532_p13, %p1854_p8  ;;  %p1541_p7 = por %p1540_p4, %p1539_p5 }
  0x21   : > { %p1535_p2 = pneg %p1534_p0 }
  0x23   : > { %p1542_p9 = pnand %p1541_p7, %p1535_p2 }
  0x25   : > { %1545 = shalt.err (!%p1542_p9)
}
  0x26   : > { %s1755_s17 = smov 64   ;;  %s1756_s18 = smov 4  }
  0x27   : > { %1419 = dma.hbm_to_vmem [thread:$0]  (!%p1840_p6), %s2144_s2, 512, %s1829_s26, [#allocation8], %s1755_s17, %s1755_s17, %s1756_s18  }
  0x28   : > { %s1546_s8 = scalar_lea.hbm %s2146_s4, 512 }
  0x29   : > { %p1547_p4 = scmp.ne.s32.totalorder %s2146_s4, %s1546_s8  ;;  %p1553_p12 = scmp.lt.u32.totalorder %s1546_s8, %s2146_s4 }
  0x2b   : > { %p1549_p10 = pnand %p1547_p4, %p1854_p8 }
  0x2d   : > { %p1550_p11 = pneg %p1549_p10 }
  0x2f   : > { %p1555_p13 = pnand %p1553_p12, %p1550_p11 }
  0x31   : > { %1558 = shalt.err (!%p1555_p13)
}
  0x32   : > { %s1559_s26 = scalar_lea.vmem %s1844_s30, 512  ;;  %p1567_p7 = scmp.lt.s32.totalorder %s1844_s30, %s1844_s30 }
  0x33   : > { %p1560_p0 = scmp.ne.s32.totalorder %s1844_s30, %s1559_s26  ;;  %p1568_p9 = scmp.lt.s32.totalorder %s1559_s26, %s1559_s26 }
  0x35   : > { %p1562_p2 = pnand %p1560_p0, %p1854_p8  ;;  %p1569_p4 = por %p1568_p9, %p1567_p7 }
  0x37   : > { %p1563_p5 = pneg %p1562_p2 }
  0x39   : > { %p1570_p10 = pnand %p1569_p4, %p1563_p5 }
  0x3b   : > { %1573 = shalt.err (!%p1570_p10)
}
  0x3c   : > { %s2149_s14 = smov 128   ;;  %s1758_s15 = smov 8  }
  0x3d   : > { %1425 = dma.hbm_to_vmem [thread:$0]  (!%p1840_p6), %s2146_s4, 512, %s1844_s30, [#allocation11], %s2149_s14, %s2149_s14, %s1758_s15  }
  0x3e   : > { %s1574_s29 = scalar_lea.hbm %s2142_s0, 16 }
  0x3f   : > { %p1575_p11 = scmp.ne.s32.totalorder %s2142_s0, %s1574_s29  ;;  %p1581_p0 = scmp.lt.u32.totalorder %s1574_s29, %s2142_s0 }
  0x41   : > { %p1577_p12 = pnand %p1575_p11, %p1854_p8 }
  0x43   : > { %p1578_p13 = pneg %p1577_p12 }
  0x45   : > { %p1583_p2 = pnand %p1581_p0, %p1578_p13 }
  0x47   : > { %1586 = shalt.err (!%p1583_p2)
}
  0x48   : > { %s1759_s12 = smov [#allocation2]   ;;  %s1760_s16 = smov [#allocation9]  }
  0x49   : > { %1416 = dma.hbm_to_smem (!%p1840_p6), %s2142_s0, 16, %s1759_s12, [#allocation5]  }
  0x4a   : > { %s221_s19 = sshll.u32 %s1760_s16, 4  ;;  %s1761_s20 = smov [#allocation12]   ;;  %s222_s19 = int_to_ptr.vmem [resolvable:$true] %s221_s19 }
  0x4b   : > { %s247_s25 = sshll.u32 %s1761_s20, 4  ;;  %s1587_s10 = scalar_lea.hbm %s2145_s3, 256  ;;  %s248_s25 = int_to_ptr.vmem [resolvable:$true] %s247_s25 }
  0x4c   : > { %p1588_p5 = scmp.ne.s32.totalorder %s2145_s3, %s1587_s10  ;;  %p1594_p4 = scmp.lt.u32.totalorder %s1587_s10, %s2145_s3 }
  0x4e   : > { %p1590_p7 = pnand %p1588_p5, %p1854_p8 }
  0x50   : > { %p1591_p9 = pneg %p1590_p7 }
  0x52   : > { %p1596_p10 = pnand %p1594_p4, %p1591_p9 }
  0x54   : > { %1599 = shalt.err (!%p1596_p10)
}
  0x55   : > { %s1600_s12 = scalar_lea.vmem %s222_s19, 256  ;;  %p1608_p0 = scmp.lt.s32.totalorder %s222_s19, %s222_s19 }
  0x56   : > { %p1601_p11 = scmp.ne.s32.totalorder %s222_s19, %s1600_s12  ;;  %p1609_p2 = scmp.lt.s32.totalorder %s1600_s12, %s1600_s12 }
  0x58   : > { %p1603_p12 = pnand %p1601_p11, %p1854_p8  ;;  %p1610_p1 = por %p1609_p2, %p1608_p0 }
  0x5a   : > { %p1604_p13 = pneg %p1603_p12 }
  0x5c   : > { %p1611_p3 = pnand %p1610_p1, %p1604_p13 }
  0x5e   : > { %1614 = shalt.err (!%p1611_p3)
}
  0x5f   : > { %1422 = dma.hbm_to_vmem [thread:$0]  (!%p1840_p6), %s2145_s3, 256, %s222_s19, [#allocation8], %s1755_s17, %s1755_s17, %s1756_s18  }
  0x60   : > { %s1615_s8 = scalar_lea.hbm %s2147_s5, 1024 }
  0x61   : > { %p1616_p1 = scmp.ne.s32.totalorder %s2147_s5, %s1615_s8  ;;  %p1622_p7 = scmp.lt.u32.totalorder %s1615_s8, %s2147_s5 }
  0x63   : > { %p1618_p3 = pnand %p1616_p1, %p1854_p8 }
  0x65   : > { %p1619_p5 = pneg %p1618_p3 }
  0x67   : > { %p1624_p9 = pnand %p1622_p7, %p1619_p5 }
  0x69   : > { %1627 = shalt.err (!%p1624_p9)
}
  0x6a   : > { %s1628_s30 = scalar_lea.vmem %s248_s25, 1024  ;;  %p1636_p12 = scmp.lt.s32.totalorder %s248_s25, %s248_s25 }
  0x6b   : > { %p1629_p4 = scmp.ne.s32.totalorder %s248_s25, %s1628_s30  ;;  %p1637_p13 = scmp.lt.s32.totalorder %s1628_s30, %s1628_s30 }
  0x6d   : > { %p1631_p10 = pnand %p1629_p4, %p1854_p8  ;;  %p1638_p0 = por %p1637_p13, %p1636_p12 }
  0x6f   : > { %p1632_p11 = pneg %p1631_p10 }
  0x71   : > { %p1639_p2 = pnand %p1638_p0, %p1632_p11 }
  0x73   : > { %1642 = shalt.err (!%p1639_p2)
}
  0x74   : > { %1428 = dma.hbm_to_vmem [thread:$0]  (!%p1840_p6), %s2147_s5, 1024, %s248_s25, [#allocation11], %s1755_s17, %s1755_s17, %s1756_s18  }
  0x75   : > { %s1151_s7 = sadd.s32 4294967294, %s1751_s24   ;;  %s1964_s13 = sadd.s32 1, %s1751_s24  }
  0x76   : > { %s53_s14 = sadd.s32 1, %s1747_s23  ;;  %s50_s26 = ssub.s32 %s1751_s24, %s1964_s13 }
  0x77   : > { %p60_p8 = scmp.ne.s32.totalorder %s1747_s23, %s1743_s22  ;;  %p51_p1 = scmp.eq.s32.totalorder %s50_s26, 0 }
  0x78   : > { %p61_p3 = scmp.eq.s32.totalorder %s1751_s24, 0  ;;  %p66_p5 = scmp.ne.s32.totalorder %s1743_s22, %s1739_s21 }
  0x79   : > { %p174_p7 = scmp.eq.s32.totalorder %s1824_s27, 1  ;;  %p2156_p4 = scmp.eq.s32.totalorder %s1824_s27, 0 }
  0x7a   : > { %s1976_s16 = scalar_select %p51_p1, %s1747_s23, %s53_s14  }
  0x7b   : > { %p62_p9 = por %p61_p3, %p60_p8  ;;  %p1980_p10 = por %p2156_p4, %p66_p5 }
  0x7c   : > { %p1984_p6 = por %p174_p7, %p60_p8  ;;  %p180_p11 = scmp.eq.s32.totalorder %s1151_s7, 1 }
  0x7d   : > { %p1442_p12 = scmp.lt.s32.totalorder %s1751_s24, 2  ;;  %s261_s18 = sand.u32 1, %s1747_s23  }
  0x7e   : > { %s2158_s17 = scalar_select %p1984_p6, 1, 0 }
  0x7f   : > { %p1990_p13 = por %p180_p11, %p66_p5  ;;  %s1159_s8 = sshll.u32 %s261_s18, 7 }
  0x80   : > { %s1255_s9 = sshll.u32 %s1751_s24, 11  ;;  %s265_s30 = scalar_lea.vmem [#allocation6], %s1159_s8 }
  0x81   : > { %s2159_s25 = scalar_select %p1990_p13, 1, 0 }
  0x82   : > { %s1998_s11 = scalar_lea.hbm %s2143_s1, %s1255_s9  ;;  %s273_s19 = sshll.u32 %s265_s30, 4  ;;  %s2004_s19 = int_to_ptr.vmem [resolvable:$true] %s273_s19 }
  0x83   : > { %p2000_p0 = pnand %p1442_p12, %p62_p9  ;;  %s2006_s7 = scalar_lea.sflag [#allocation3], %s261_s18 }
  0x84   : > { %s1643_s14 = scalar_lea.hbm %s1998_s11, 2048  ;;  %s1648_s9 = scalar_lea.hbm %s2143_s1, 4096 }
  0x85   : > { %p1644_p2 = scmp.ne.s32.totalorder %s1998_s11, %s1643_s14  ;;  %p1645_p8 = pneg %p2000_p0 }
  0x86   : > { %p1649_p5 = scmp.lt.u32.totalorder %s1998_s11, %s2143_s1  ;;  %p1650_p7 = scmp.lt.u32.totalorder %s1648_s9, %s1643_s14 }
  0x87   : > { %p1646_p1 = pnand %p1645_p8, %p1644_p2  ;;  %p1652_p4 = scmp.lt.u32.totalorder %s1643_s14, %s1998_s11 }
  0x88   : > { %p1651_p9 = por %p1650_p7, %p1649_p5 }
  0x89   : > { %p1647_p3 = pneg %p1646_p1 }
  0x8a   : > { %p1653_p11 = por %p1652_p4, %p1651_p9 }
  0x8c   : > { %p1654_p12 = pnand %p1653_p11, %p1647_p3 }
  0x8e   : > { %1657 = shalt.err (!%p1654_p12)
}
  0x8f   : > { %s1658_s18 = scalar_lea.vmem %s2004_s19, 2048  ;;  %s1762_s30 = smov [#allocation6]  }
  0x90   : > { %p1659_p2 = scmp.ne.s32.totalorder %s2004_s19, %s1658_s18  ;;  %s1663_s26 = sshll.u32 %s1762_s30, 4  ;;  %s1664_s26 = int_to_ptr.vmem [resolvable:$false] %s1663_s26 }
  0x91   : > { %s1665_s8 = scalar_lea.vmem %s1664_s26, 4096  ;;  %p1666_p6 = scmp.lt.s32.totalorder %s2004_s19, %s1664_s26 }
  0x92   : > { %p1661_p1 = pnand %p1659_p2, %p1645_p8  ;;  %p1667_p5 = scmp.lt.s32.totalorder %s1665_s8, %s1658_s18 }
  0x94   : > { %p1662_p13 = pneg %p1661_p1  ;;  %p1668_p7 = por %p1667_p5, %p1666_p6 }
  0x96   : > { %p1669_p9 = pnand %p1668_p7, %p1662_p13 }
  0x98   : > { %1672 = shalt.err (!%p1669_p9)
}
  0x99   : > { %s2161_s14 = smov 128   ;;  %p2162_p8 = scmp.ne.s32.totalorder %s2153_s28, 0 }
  0x9a   : > { %1432 = dma.hbm_to_vmem [thread:$0]  (!%p2000_p0), %s1998_s11, 2048, %s2004_s19, %s2006_s7, %s2161_s14, %s2161_s14, %s1758_s15  }
  0x9b   : > { %285 = sbr.rel (%p2162_p8) target bundleno = 910 (0x38e), region = 44  ;;  %p2163_p3 = scmp.eq.s32.totalorder (!%p2162_p8), %s1824_s27, 0 }
  0xa2   : > { %1718 = dma.done.wait (%p2163_p3), [#allocation5], 16   ;;  %p2164_p4 = pmov %p2163_p3 }
  0xa3   : > { %s2044_s9 = sand.u32 1, %s1743_s22  }
  0xa4   : > { %1720 = vsyncadd (%p2164_p4), [#allocation5], 4294967280  ;;  %s1165_s12 = sshll.u32 %s2044_s9, 7  ;;  %s292_s10 = scalar_lea.sflag [#allocation3], %s2044_s9 }
  0xa5   : > { %s2048_s29 = scalar_lea.vmem [#allocation6], %s1165_s12 }
  0xa6   : > { %1722 = dma.done.wait (%p1980_p10), %s292_s10, 2048  }
  0xa7   : > { %1724 = vsyncadd (%p1980_p10), %s292_s10, 4294965248  ;;  %p2165_p6 = pmov %p2163_p3 }
  0xa8   : > { %p2166_p13 = pmov %p2163_p3 }
  0xa9   : > { %1726 = dma.done.wait (%p2165_p6), [#allocation8], 768  }
  0xaa   : > { %1728 = vsyncadd (%p2166_p13), [#allocation8], 4294966528  ;;  %p2167_p0 = pmov %p2163_p3 }
  0xac   : > { %1730 = dma.done.wait (%p2167_p0), [#allocation11], 1536   ;;  %p2168_p11 = pmov %p2167_p0 }
  0xae   : > { %1732 = vsyncadd (%p2168_p11), [#allocation11], 4294965760 }
  0xaf   : > { %316 = sfence }
  0xb0   : > { %v1494_v0 = vld [vmem:[#allocation7] sm:$0xff]   ;;  %s1171_s28 = sshll.u32 %s1824_s27, 1  ;;  %v1495_v1 = vld [vmem:[#allocation7 + $0x8] sm:$0xff]   ;;  %v1496_v2 = vld [vmem:[#allocation7 + $0x10] sm:$0xff]   ;;  %v1763_v11 = vmov 0.0   ;;  %vm455_vm4 = vcmask 523264  }
  0xb1   : > { %s353_s15 = sld [smem:[#allocation2 + %s1171_s28]]  ;;  %1301 = vmatprep.subr.bf16.mxu0 %v1494_v0  ;;  %s392_s20 = sadd.s32 1, %s1171_s28  ;;  %v345_v3 = vld [vmem:[%s2048_s29] sm:$0xff]  ;;  %v346_v4 = vld [vmem:[%s2048_s29 + $0x8] sm:$0xff]  ;;  %v347_v5 = vld [vmem:[%s2048_s29 + $0x10] sm:$0xff] }
  0xb2   : > { %1302 = vmatpush3.bf16.msra.mxu0 %v1494_v0  ;;  %s393_s11 = sld [smem:[#allocation2 + %s392_s20]]  ;;  %v348_v6 = vld [vmem:[%s2048_s29 + $0x18] sm:$0xff]  ;;  %v349_v8 = vld [vmem:[%s2048_s29 + $0x20] sm:$0xff]  ;;  %v350_v10 = vld [vmem:[%s2048_s29 + $0x28] sm:$0xff]  ;;  %s1170_s19 = sshll.u32 %s2044_s9, 1 }
  0xb3   : > { %1303 = vmatprep.subr.bf16.mxu0 %v1495_v1  ;;  %v1497_v9 = vld [vmem:[#allocation7 + $0x18] sm:$0xff]   ;;  %v351_v14 = vld [vmem:[%s2048_s29 + $0x30] sm:$0xff]  ;;  %v1180_v22 = vld [vmem:[%s2048_s29 + $0x40] sm:$0xff]  ;;  %s340_s7 = scalar_lea.vmem [#allocation13], %s1170_s19  ;;  %s1256_s18 = sshll.u32 %s1824_s27, 5 }
  0xb4   : > { %v352_v15 = vld [vmem:[%s2048_s29 + $0x38] sm:$0xff]  ;;  %v1181_v23 = vld [vmem:[%s2048_s29 + $0x48] sm:$0xff]  ;;  %v1182_v30 = vld [vmem:[%s2048_s29 + $0x50] sm:$0xff]  ;;  %s1028_s30 = sshll.u32 %s340_s7, 4  ;;  %s2096_s14 = scalar_lea.hbm %s2148_s6, %s1256_s18  ;;  %s2098_s30 = int_to_ptr.vmem [resolvable:$true] %s1028_s30 }
  0xb5   : > { %v1183_v31 = vld [vmem:[%s2048_s29 + $0x58] sm:$0xff]  ;;  %v1184_v32 = vld [vmem:[%s2048_s29 + $0x60] sm:$0xff]  ;;  %v1185_v33 = vld [vmem:[%s2048_s29 + $0x68] sm:$0xff]  ;;  %s1015_s12 = scalar_lea.sflag [#allocation4], %s2044_s9  ;;  %s1673_s10 = scalar_lea.vmem %s2098_s30, 32 }
  0xb6   : > { %1304 = vmatpush3.bf16.msra.mxu0 %v1495_v1  ;;  %v1186_v40 = vld [vmem:[%s2048_s29 + $0x70] sm:$0xff]  ;;  %v1187_v41 = vld [vmem:[%s2048_s29 + $0x78] sm:$0xff]  ;;  %v1498_v47 = vld [vmem:[#allocation9] sm:$0xff]   ;;  %p1674_p10 = scmp.ne.s32.totalorder %s2098_s30, %s1673_s10  ;;  %p2169_p12 = scmp.ne.s32.totalorder %s2158_s17, 0 }
  0xb7   : > { %v354_v7 = vstv %s353_s15  ;;  %1305 = vmatprep.subr.bf16.mxu0 %v1496_v2  ;;  %1333 = vmatprep.mubr.msk.bf16.mxu1 %vm455_vm4, %v1498_v47  ;;  %v1502_v48 = vld [vmem:[#allocation12] sm:$0xff]   ;;  %v1503_v49 = vld [vmem:[#allocation12 + $0x8] sm:$0xff]   ;;  %v1504_v50 = vld [vmem:[#allocation12 + $0x10] sm:$0xff]   ;;  %s1765_s27 = smov [#allocation13]  }
  0xb8   : > { %vm355_vm0 = vcmp.gt.f32.partialorder %v345_v3, %v354_v7  ;;  %vm356_vm1 = vcmp.gt.f32.partialorder %v346_v4, %v354_v7  ;;  %vm357_vm2 = vcmp.gt.f32.partialorder %v347_v5, %v354_v7  ;;  %vm358_vm3 = vcmp.gt.f32.partialorder %v348_v6, %v354_v7  ;;  %v1505_v51 = vld [vmem:[#allocation12 + $0x18] sm:$0xff]   ;;  %v1506_v52 = vld [vmem:[#allocation12 + $0x20] sm:$0xff]   ;;  %v1508_v53 = vld [vmem:[#allocation12 + $0x28] sm:$0xff]   ;;  %p1675_p2 = pnand %p1674_p10, %p2169_p12  ;;  %s1677_s29 = sshll.u32 %s1765_s27, 4  ;;  %s1678_s29 = int_to_ptr.vmem [resolvable:$false] %s1677_s29 }
  0xb9   : > { %v1172_v12 = vsel %vm355_vm0, 1.0, %v1763_v11  ;;  %v1173_v13 = vsel %vm356_vm1, 1.0, %v1763_v11  ;;  %vm359_vm5 = vcmp.gt.f32.partialorder %v349_v8, %v354_v7  ;;  %v1174_v17 = vsel %vm357_vm2, 1.0, %v1763_v11  ;;  %v1499_v5 = vld [vmem:[#allocation9 + $0x8] sm:$0xff]   ;;  %v1500_v8 = vld [vmem:[#allocation9] sm:$0xff]   ;;  %s1679_s28 = scalar_lea.vmem %s1678_s29, 64  ;;  %p1680_p5 = scmp.lt.s32.totalorder %s2098_s30, %s1678_s29 }
  0xba   : > { %v379_v16 = vpack.c.bf16 %v1173_v13, %v1172_v12  ;;  %1306 = vmatpush3.bf16.msra.mxu0 %v1496_v2  ;;  %v1175_v18 = vsel %vm358_vm3, 1.0, %v1763_v11  ;;  %vm360_vm6 = vcmp.gt.f32.partialorder %v350_v10, %v354_v7  ;;  %v394_v19 = vstv %s393_s11  ;;  %p1676_p1 = pneg %p1675_p2  ;;  %p1681_p7 = scmp.lt.s32.totalorder %s1679_s28, %s1673_s10 }
  0xbb   : > { %1307 = vmatprep.subr.bf16.mxu0 %v1497_v9  ;;  %v1176_v20 = vsel %vm359_vm5, 1.0, %v1763_v11  ;;  %v1177_v21 = vsel %vm360_vm6, 1.0, %v1763_v11  ;;  %v380_v24 = vpack.c.bf16 %v1175_v18, %v1174_v17  ;;  %vm361_vm7 = vcmp.gt.f32.partialorder %v351_v14, %v354_v7  ;;  %v1501_v17 = vld [vmem:[#allocation9 + $0x8] sm:$0xff]   ;;  %v1509_v18 = vld [vmem:[#allocation12 + $0x8] sm:$0xff]  }
  0xbc   : > { %1309 = vmatprep.mubr.msk.bf16.mxu0 %vm455_vm4, %v379_v16  ;;  %vm362_vm8 = vcmp.gt.f32.partialorder %v352_v15, %v354_v7  ;;  %v381_v25 = vpack.c.bf16 %v1177_v21, %v1176_v20  ;;  %vm395_vm9 = vcmp.gt.f32.partialorder %v1180_v22, %v394_v19  ;;  %vm396_vm10 = vcmp.gt.f32.partialorder %v1181_v23, %v394_v19  ;;  %v1507_v16 = vld [vmem:[#allocation12] sm:$0xff]   ;;  %v1511_v20 = vld [vmem:[#allocation12 + $0x10] sm:$0xff]   ;;  %v1512_v21 = vld [vmem:[#allocation12 + $0x38] sm:$0xff]   ;;  %p1682_p9 = por %p1681_p7, %p1680_p5 }
  0xbd   : > { %v1178_v26 = vsel %vm361_vm7, 1.0, %v1763_v11  ;;  %v1179_v27 = vsel %vm362_vm8, 1.0, %v1763_v11  ;;  %v1188_v28 = vsel %vm395_vm9, 1.0, %v1763_v11  ;;  %v1189_v29 = vsel %vm396_vm10, 1.0, %v1763_v11  ;;  %v1513_v22 = vld [vmem:[#allocation12 + $0x18] sm:$0xff]   ;;  %v1514_v23 = vld [vmem:[#allocation12 + $0x20] sm:$0xff]  }
  0xbe   : > { %1308 = vmatpush3.bf16.msra.mxu0 %v1497_v9  ;;  %v382_v34 = vpack.c.bf16 %v1179_v27, %v1178_v26  ;;  %v419_v35 = vpack.c.bf16 %v1189_v29, %v1188_v28  ;;  %vm397_vm11 = vcmp.gt.f32.partialorder %v1182_v30, %v394_v19  ;;  %vm398_vm12 = vcmp.gt.f32.partialorder %v1183_v31, %v394_v19  ;;  %v1517_v26 = vld [vmem:[#allocation12 + $0x38] sm:$0xff]   ;;  %v652_v27 = vld [vmem:[#allocation10 + $0x10] sm:$0xff]  ;;  %v650_v28 = vld [vmem:[#allocation10] sm:$0xff]  ;;  %p1683_p8 = pnand %p1682_p9, %p1676_p1 }
  0xbf   : > { %vm399_vm13 = vcmp.gt.f32.partialorder %v1184_v32, %v394_v19  ;;  %vm400_vm14 = vcmp.gt.f32.partialorder %v1185_v33, %v394_v19  ;;  %v1190_v36 = vsel %vm397_vm11, 1.0, %v1763_v11  ;;  %v1191_v37 = vsel %vm398_vm12, 1.0, %v1763_v11  ;;  %1337 = vmatprep.subr.bf16.mxu0 %v1502_v48  ;;  %v653_v30 = vld [vmem:[#allocation10 + $0x18] sm:$0xff]  ;;  %v651_v33 = vld [vmem:[#allocation10 + $0x8] sm:$0xff] }
  0xc0   : > { %v1192_v38 = vsel %vm399_vm13, 1.0, %v1763_v11  ;;  %v1193_v39 = vsel %vm400_vm14, 1.0, %v1763_v11  ;;  %v420_v42 = vpack.c.bf16 %v1191_v37, %v1190_v36  ;;  %vm401_vm15 = vcmp.gt.f32.partialorder %v1186_v40, %v394_v19 }
  0xc1   : > { %1310 = vmatmul.mubr.msk.bf16.vlgmr.msra.gmra.mrb[0].mxu0 %vm455_vm4, %v380_v24  ;;  %v421_v43 = vpack.c.bf16 %v1193_v39, %v1192_v38  ;;  %vm402_vm0 = vcmp.gt.f32.partialorder %v1187_v41, %v394_v19  ;;  %v1194_v44 = vsel %vm401_vm15, 1.0, %v1763_v11  ;;  %v1510_v19 = vld [vmem:[#allocation12 + $0x30] sm:$0xff]   ;;  %v1515_v24 = vld [vmem:[#allocation12 + $0x28] sm:$0xff]   ;;  %v1764_v39 = vmov 1.0|1.0  }
  0xc2   : > { %1313 = vmatprep.mubr.msk.bf16.mxu0 %vm455_vm4, %v381_v25  ;;  %v1195_v45 = vsel %vm402_vm0, 1.0, %v1763_v11  ;;  %1338 = vmatpush3.bf16.msra.mxu0 %v1502_v48  ;;  %v1516_v25 = vld [vmem:[#allocation12 + $0x30] sm:$0xff]  }
  0xc3   : > { %v422_v46 = vpack.c.bf16 %v1195_v45, %v1194_v44  ;;  %1339 = vmatprep.subr.bf16.mxu0 %v1503_v49 }
  0xc6   : > { %1340 = vmatpush3.bf16.msra.mxu0 %v1503_v49 }
  0xc7   : > { %1341 = vmatprep.subr.bf16.mxu0 %v1504_v50 }
  0xc9   : > { %1314 = vmatmul.mubr.msk.bf16.gmra.mrb[4].mxu0 %vm455_vm4, %v382_v34 }
  0xca   : > { %1317 = vmatprep.mubr.msk.bf16.mxu0 %vm455_vm4, %v419_v35  ;;  %1342 = vmatpush3.bf16.msra.mxu0 %v1504_v50 }
  0xcb   : > { %1343 = vmatprep.subr.bf16.mxu0 %v1505_v51 }
  0xce   : > { %1344 = vmatpush3.bf16.msra.mxu0 %v1505_v51 }
  0xcf   : > { %1345 = vmatprep.subr.bf16.mxu0 %v1506_v52 }
  0xd1   : > { %1318 = vmatmul.mubr.msk.bf16.gmra.mrb[8].mxu0 %vm455_vm4, %v420_v42 }
  0xd2   : > { %1321 = vmatprep.mubr.msk.bf16.mxu0 %vm455_vm4, %v421_v43  ;;  %1346 = vmatpush3.bf16.msra.mxu0 %v1506_v52 }
  0xd3   : > { %1347 = vmatprep.subr.bf16.mxu0 %v1508_v53 }
  0xd6   : > { %1348 = vmatpush3.bf16.msra.mxu0 %v1508_v53 }
  0xd7   : > { %1349 = vmatprep.subr.bf16.mxu0 %v1510_v19 }
  0xd9   : > { %1322 = vmatmul.mubr.msk.bf16.gmra.mrb[12].mxu0 %vm455_vm4, %v422_v46 }
  0xda   : > { %1350 = vmatpush3.bf16.msra.mxu0 %v1510_v19 }
  0xdb   : > { %1351 = vmatprep.subr.bf16.mxu0 %v1512_v21 }
  0xde   : > { %1352 = vmatpush3.bf16.msra.mxu0 %v1512_v21 }
 0x194   : > { %v1311_v54 = vpop.f32.mrb[0].mxu0 }
 0x195   : > { %v514_v55 = vpop.f32.mrb[1].mxu0 }
 0x196   : > { %v1312_v56 = vpop.f32.mrb[2].mxu0 }
 0x197   : > { %v578_v57 = vpack.c.bf16 %v1312_v56, %v1311_v54  ;;  %v517_v58 = vpop.f32.mrb[3].mxu0 }
 0x198   : > { %v577_v59 = vpack.c.bf16 %v517_v58, %v514_v55 }
 0x19a   : > { %1325 = vmatprep.subr.bf16.mxu1 %v577_v59 }
 0x19b   : > { %1326 = vmatpush3.bf16.msra.mxu1 %v577_v59 }
 0x19c   : > { %v1315_v60 = vpop.f32.mrb[4].mxu0  ;;  %1327 = vmatprep.subr.bf16.mxu1 %v578_v57 }
 0x19d   : > { %v530_v61 = vpop.f32.mrb[5].mxu0 }
 0x19e   : > { %v1316_v62 = vpop.f32.mrb[6].mxu0 }
 0x19f   : > { %v580_v63 = vpack.c.bf16 %v1316_v62, %v1315_v60  ;;  %v533_v0 = vpop.f32.mrb[7].mxu0  ;;  %1328 = vmatpush3.bf16.msra.mxu1 %v578_v57 }
 0x1a0   : > { %v579_v1 = vpack.c.bf16 %v533_v0, %v530_v61 }
 0x1a2   : > { %1329 = vmatprep.subr.bf16.mxu1 %v579_v1 }
 0x1a3   : > { %1330 = vmatpush3.bf16.msra.mxu1 %v579_v1 }
 0x1a4   : > { %v1319_v2 = vpop.f32.mrb[8].mxu0  ;;  %1331 = vmatprep.subr.bf16.mxu1 %v580_v63 }
 0x1a5   : > { %v546_v3 = vpop.f32.mrb[9].mxu0 }
 0x1a6   : > { %v1320_v4 = vpop.f32.mrb[10].mxu0 }
 0x1a7   : > { %v796_v6 = vpack.c.bf16 %v1320_v4, %v1319_v2  ;;  %v549_v7 = vpop.f32.mrb[11].mxu0  ;;  %1332 = vmatpush3.bf16.msra.mxu1 %v580_v63 }
 0x1a8   : > { %v795_v9 = vpack.c.bf16 %v549_v7, %v546_v3 }
 0x1aa   : > { %1334 = vmatmul.mubr.msk.bf16.vlgmr.msra.gmra.mrb[0].mxu1 %vm455_vm4, %v1499_v5  ;;  %1357 = vmatprep.subr.bf16.mxu1 %v795_v9 }
 0x1ab   : > { %1358 = vmatpush3.bf16.msra.mxu1 %v795_v9  ;;  %1365 = vmatprep.mubr.msk.bf16.mxu1 %vm455_vm4, %v1500_v8 }
 0x1ac   : > { %v1323_v10 = vpop.f32.mrb[12].mxu0  ;;  %1359 = vmatprep.subr.bf16.mxu1 %v796_v6 }
 0x1ad   : > { %v562_v11 = vpop.f32.mrb[13].mxu0 }
 0x1ae   : > { %v1324_v12 = vpop.f32.mrb[14].mxu0 }
 0x1af   : > { %v798_v13 = vpack.c.bf16 %v1324_v12, %v1323_v10  ;;  %v565_v14 = vpop.f32.mrb[15].mxu0  ;;  %1360 = vmatpush3.bf16.msra.mxu1 %v796_v6 }
 0x1b0   : > { %v797_v15 = vpack.c.bf16 %v565_v14, %v562_v11 }
 0x1b2   : > { %1361 = vmatprep.subr.bf16.mxu1 %v797_v15 }
 0x1b3   : > { %1362 = vmatpush3.bf16.msra.mxu1 %v797_v15 }
 0x1b4   : > { %1363 = vmatprep.subr.bf16.mxu1 %v798_v13 }
 0x1b7   : > { %1364 = vmatpush3.bf16.msra.mxu1 %v798_v13 }
 0x1b8   : > { %1369 = vmatprep.subr.bf16.mxu1 %v1507_v16 }
 0x1ba   : > { %1366 = vmatmul.mubr.msk.bf16.vlgmr.msra.gmra.mrb[4].mxu1 %vm455_vm4, %v1501_v17 }
 0x1bb   : > { %1370 = vmatpush3.bf16.msra.mxu1 %v1507_v16 }
 0x1bc   : > { %1371 = vmatprep.subr.bf16.mxu1 %v1509_v18 }
 0x1bf   : > { %1372 = vmatpush3.bf16.msra.mxu1 %v1509_v18 }
 0x1c0   : > { %1373 = vmatprep.subr.bf16.mxu1 %v1511_v20 }
 0x1c3   : > { %1374 = vmatpush3.bf16.msra.mxu1 %v1511_v20 }
 0x1c4   : > { %1375 = vmatprep.subr.bf16.mxu1 %v1513_v22 }
 0x1c7   : > { %1376 = vmatpush3.bf16.msra.mxu1 %v1513_v22 }
 0x1c8   : > { %1377 = vmatprep.subr.bf16.mxu1 %v1514_v23 }
 0x1cb   : > { %1378 = vmatpush3.bf16.msra.mxu1 %v1514_v23 }
 0x1cc   : > { %1379 = vmatprep.subr.bf16.mxu1 %v1515_v24 }
 0x1cf   : > { %1380 = vmatpush3.bf16.msra.mxu1 %v1515_v24 }
 0x1d0   : > { %1381 = vmatprep.subr.bf16.mxu1 %v1516_v25 }
 0x1d3   : > { %1382 = vmatpush3.bf16.msra.mxu1 %v1516_v25 }
 0x1d4   : > { %1383 = vmatprep.subr.bf16.mxu1 %v1517_v26 }
 0x1d7   : > { %1384 = vmatpush3.bf16.msra.mxu1 %v1517_v26 }
 0x27d   : > { %v1335_v29 = vpop.f32.mrb[0].mxu1 }
 0x27e   : > { %v656_v31 = vmul.f32 %v1335_v29, %v652_v27  ;;  %v635_v32 = vpop.f32.mrb[1].mxu1 }
 0x27f   : > { %v654_v34 = vmul.f32 %v650_v28, %v635_v32  ;;  %v1336_v35 = vpop.f32.mrb[2].mxu1 }
 0x280   : > { %vm660_vm1 = vcmp.gt.f32.partialorder %v656_v31, 0.0  ;;  %v657_v36 = vmul.f32 %v1336_v35, %v653_v30  ;;  %v638_v37 = vpop.f32.mrb[3].mxu1 }
 0x281   : > { %v655_v38 = vmul.f32 %v651_v33, %v638_v37  ;;  %vm658_vm3 = vcmp.gt.f32.partialorder %v654_v34, 0.0 }
 0x282   : > { %vm661_vm2 = vcmp.gt.f32.partialorder %v657_v36, 0.0 }
 0x283   : > { %vm1226_vm4 = vmpackc.low %vm661_vm2, %vm660_vm1  ;;  %vm659_vm5 = vcmp.gt.f32.partialorder %v655_v38, 0.0 }
 0x284   : > { %vm1224_vm6 = vmpackc.low %vm659_vm5, %vm658_vm3 }
 0x285   : > { %1353 = vmatprep.mubr.msk.bf16.mxu0 %vm1224_vm6, %v1764_v39 }
 0x286   : > { %1354 = vmatmul.mubr.msk.bf16.vlgmr.msra.gmra.mrb[16].mxu0 %vm1226_vm4, %v1764_v39 }
 0x28d   : > { %v1367_v40 = vpop.f32.mrb[4].mxu1 }
 0x28e   : > { %v874_v41 = vmul.f32 %v1367_v40, %v652_v27  ;;  %v853_v42 = vpop.f32.mrb[5].mxu1 }
 0x28f   : > { %v872_v43 = vmul.f32 %v853_v42, %v650_v28  ;;  %v1368_v44 = vpop.f32.mrb[6].mxu1 }
 0x290   : > { %v875_v45 = vmul.f32 %v1368_v44, %v653_v30  ;;  %v856_v46 = vpop.f32.mrb[7].mxu1  ;;  %vm878_vm7 = vcmp.gt.f32.partialorder %v874_v41, 0.0 }
 0x291   : > { %v873_v47 = vmul.f32 %v856_v46, %v651_v33  ;;  %vm876_vm9 = vcmp.gt.f32.partialorder %v872_v43, 0.0 }
 0x292   : > { %vm879_vm8 = vcmp.gt.f32.partialorder %v875_v45, 0.0 }
 0x293   : > { %vm1246_vm10 = vmpackc.low %vm879_vm8, %vm878_vm7  ;;  %vm877_vm11 = vcmp.gt.f32.partialorder %v873_v47, 0.0 }
 0x294   : > { %vm1244_vm12 = vmpackc.low %vm877_vm11, %vm876_vm9 }
 0x295   : > { %1385 = vmatprep.mubr.msk.bf16.mxu1 %vm1244_vm12, %v1764_v39 }
 0x296   : > { %1386 = vmatmul.mubr.msk.bf16.vlgmr.msra.gmra.mrb[8].mxu1 %vm1246_vm10, %v1764_v39 }
 0x359   : > { %v1355_v48 = vpop.f32.mrb[16].mxu0 }
 0x35a   : > { %v770_v49 = vpop.f32.mrb[17].mxu0 }
 0x35b   : > { %v1356_v50 = vpop.f32.mrb[18].mxu0 }
 0x35c   : > { %v773_v51 = vpop.f32.mrb[19].mxu0 }
 0x35d   : > { %v785_v52 = vadd.f32 %v773_v51, %v770_v49 }
 0x35f   : > { %v786_v53 = vadd.f32 %v1355_v48, %v785_v52 }
 0x361   : > { %v787_v54 = vadd.f32 %v1356_v50, %v786_v53 }
 0x363   : > { %v788_v55 = vrot.slane %v787_v54, 4 }
 0x365   : > { %v789_v56 = vadd.f32 %v788_v55, %v787_v54 }
 0x367   : > { %v790_v57 = vrot.slane %v789_v56, 2 }
 0x369   : > { %v791_v58 = vadd.f32 %v790_v57, %v789_v56  ;;  %v1387_v59 = vpop.f32.mrb[8].mxu1 }
 0x36a   : > { %v988_v60 = vpop.f32.mrb[9].mxu1 }
 0x36b   : > { %v792_v61 = vrot.slane %v791_v58, 1  ;;  %v1388_v62 = vpop.f32.mrb[10].mxu1 }
 0x36c   : > { %v991_v63 = vpop.f32.mrb[11].mxu1 }
 0x36d   : > { %v793_v0 = vadd.f32 %v792_v61, %v791_v58  ;;  %v1003_v1 = vadd.f32 %v991_v63, %v988_v60 }
 0x36f   : > { %v1004_v2 = vadd.f32 %v1387_v59, %v1003_v1  ;;  %794 = vst [vmem:[%s340_s7] sm:$0x1] %v793_v0 }
 0x371   : > { %v1005_v3 = vadd.f32 %v1388_v62, %v1004_v2 }
 0x373   : > { %v1006_v4 = vrot.slane %v1005_v3, 4 }
 0x375   : > { %v1007_v5 = vadd.f32 %v1006_v4, %v1005_v3 }
 0x377   : > { %v1008_v6 = vrot.slane %v1007_v5, 2 }
 0x379   : > { %v1009_v7 = vadd.f32 %v1008_v6, %v1007_v5 }
 0x37b   : > { %v1010_v8 = vrot.slane %v1009_v7, 1 }
 0x37d   : > { %v1011_v9 = vadd.f32 %v1010_v8, %v1009_v7 }
 0x37f   : > { %1248 = vst [vmem:[%s340_s7 + $0x1] sm:$0x1] %v1011_v9 }
 0x380   : > { %1686 = shalt.err (!%p1683_p8)
}
 0x381   : > { %s1687_s15 = scalar_lea.hbm %s2096_s14, 32  ;;  %s1691_s19 = scalar_lea.hbm %s2148_s6, 64 }
 0x382   : > { %p1688_p3 = scmp.ne.s32.totalorder %s2096_s14, %s1687_s15  ;;  %p1692_p13 = scmp.lt.u32.totalorder %s2096_s14, %s2148_s6 }
 0x383   : > { %p1693_p0 = scmp.lt.u32.totalorder %s1691_s19, %s1687_s15  ;;  %p1695_p10 = scmp.lt.u32.totalorder %s1687_s15, %s2096_s14 }
 0x384   : > { %p1689_p4 = pnand %p1688_p3, %p2169_p12 }
 0x385   : > { %p1694_p11 = por %p1693_p0, %p1692_p13 }
 0x386   : > { %p1690_p6 = pneg %p1689_p4 }
 0x387   : > { %p1696_p2 = por %p1695_p10, %p1694_p11 }
 0x389   : > { %p1697_p1 = pnand %p1696_p2, %p1690_p6 }
 0x38b   : > { %1700 = shalt.err (!%p1697_p1)
}
 0x38c   : > { %s1766_s26 = smov 16   ;;  %s1767_s8 = smov 1  }
 0x38d   : > { %1411 = dma.vmem_to_hbm [thread:$0]  (%p2169_p12), %s2098_s30, 32, %s2096_s14, %s1015_s12, %s1766_s26, %s1766_s26, %s1767_s8  }
 0x38e PF: > { %s1043_s10 = sand.u32 1, %s1739_s21   ;;  %p2170_p5 = scmp.ne.s32.totalorder %s2159_s25, 0 }
 0x38f   : > { %p2171_p7 = scmp.ge.s32.totalorder %s1751_s24, 2  ;;  %s1044_s27 = scalar_lea.sflag [#allocation4], %s1043_s10 }
 0x391   : > { %p1434_p9 = pnand %p2171_p7, %p2170_p5 }
 0x393   : > { %1734 = dma.done.wait (!%p1434_p9), %s1044_s27, 32  }
 0x394   : > { %1736 = vsyncadd (!%p1434_p9), %s1044_s27, 4294967264  ;;  %p22_p8 = scmp.ge.s32.totalorder %s1964_s13, 4   ;;  %s2172_s21 = smov %s1743_s22 }
 0x395   : > { %s2173_s22 = smov %s1747_s23  ;;  %s2174_s23 = smov %s1976_s16 }
 0x396   : > { %s2175_s24 = smov %s1964_s13  ;;  %24 = sbr.rel (!%p22_p8) target bundleno = 8 (0x8), region = 112 }
 0x39d   :  { %1049 = vsyncpa [#allocation3], 1 }
 0x39e   :  { %1051 = vsyncpa [#allocation3 + $0x1], 1 }
 0x39f   :  { %1052 = vsyncpa [#allocation8], 1 }
 0x3a0   :  { %1053 = vsyncpa [#allocation11], 1 }
 0x3a1   :  { %1054 = vsyncpa [#allocation4], 1 }
 0x3a2   :  { %1056 = vsyncpa [#allocation4 + $0x1], 1 }
 0x3a3   :  { %1057 = vsyncpa [#allocation5], 1 }
 0x3a4   :  { %1059 = vsyncpa [#allocation5 + $0x1], 1 }

</bundles_post_ra>
